<compile_context>
chip_gen: v6e
topology: v6e:2x2x1
jax: 0.10.0
libtpu: 0.0.40
codegen_flags: <defaults>
</compile_context>

<pallas_src>
import jax
import jax.numpy as jnp
from jax.experimental import pallas as pl
from jax.experimental.pallas import tpu as pltpu

_LANE = 128
_SUBLANE = 8


def mlp_kernel(x_ref, w1_ref, b1_ref, w2_ref, b2_ref, w3_ref, b3_ref, o_ref):
    # x tile: (block_b, D_in) in native dtype; cast to f32 inside the kernel
    # (parity with PyTorch's x.float() without an extra HBM pass).
    x = x_ref[...].astype(jnp.float32)

    # Layer 1 on the MXU, transposed so the result is lane-dense:
    #   h1^T = W1 @ x^T  — contract last dims of (H, D_in) and (block_b, D_in).
    h1 = jax.lax.dot_general(
        w1_ref[...], x, (((1,), (1,)), ((), ())),
        preferred_element_type=jnp.float32)               # (H, block_b)
    h1 = jnp.maximum(h1 + b1_ref[...], 0.0)               # bias (H,1) lane-bcast, ReLU

    # Layer 2 on the MXU: (2, H) @ (H, block_b) -> (2, block_b), lane-dense.
    h2 = jnp.dot(w2_ref[...], h1, preferred_element_type=jnp.float32)
    r0 = jnp.maximum(h2[0:1, :] + b2_ref[0], 0.0)          # ReLU rows, SMEM bias scalars
    r1 = jnp.maximum(h2[1:2, :] + b2_ref[1], 0.0)

    # Layer 3 (K=2, N=1) on the VPU with SMEM scalars; stays lane-dense.
    y = r0 * w3_ref[0] + r1 * w3_ref[1] + b3_ref[0]         # (1, block_b)
    o_ref[...] = jax.nn.sigmoid(y)                          # EUP sigmoid


def _round_up(x, m):
    return -(-x // m) * m


def _vmem_capacity_bytes():
    """Physical VMEM per TensorCore; falls back to the most restrictive gen."""
    try:
        cap = int(getattr(pltpu.get_tpu_info(), "vmem_capacity_bytes"))
        if cap > 0:
            return cap
    except Exception:
        pass
    return 64 << 20  # v7x per-TC VMEM (safe floor for v5e/v6e too)


def _per_row_vmem_bytes(D_in, H, itemsize):
    """VMEM bytes per batch row, including (8,128) lane/sublane padding."""
    d_pad = _round_up(D_in, _LANE)       # x lanes padded to 128
    h_sub = _round_up(H, _SUBLANE)       # h1^T sublanes padded to 8
    return (2 * d_pad * itemsize         # x tile, double-buffered, lane-padded
            + d_pad * 4                  # in-kernel f32 cast of the x tile
            + h_sub * 4                  # h1^T (H, block_b)
            + 2 * _SUBLANE * 4           # (1, block_b) out tile -> 8 sublanes, 2 bufs
            + 6 * _SUBLANE * 4)          # h2 / r0 / r1 / y slack


def _fixed_vmem_bytes(D_in, H):
    d_pad = _round_up(D_in, _LANE)
    h_sub = _round_up(H, _SUBLANE)
    h_lane = _round_up(H, _LANE)
    w = (h_sub * d_pad                   # w1 tile
         + h_sub * _LANE                 # b1 (H,1) -> (H,128) lanes
         + _SUBLANE * h_lane) * 4        # w2 (2,H) -> (8, H_pad)
    return 2 * w + (2 << 20)             # double-buffered weights + headroom


def _default_block_b(B, D_in, H, itemsize, vmem_cap):
    if B <= 1024:
        return B                         # single tile; tiny relative to VMEM
    per_row = _per_row_vmem_bytes(D_in, H, itemsize)
    budget = vmem_cap - (8 << 20)        # pipeline / runtime headroom
    # Generation-aware hard cap: ~16K rows on 64 MiB VMEM (v7x), 32K on 128 MiB.
    cap = 16384 if vmem_cap <= (64 << 20) else 32768
    fit = max(_LANE, (budget - _fixed_vmem_bytes(D_in, H)) // per_row)
    cap = min(cap, (fit // _LANE) * _LANE)
    # Always >= 2 grid steps so "parallel" can shard across v7x's two TCs.
    half = _round_up(_round_up(B, 2) // 2, _LANE)
    return int(max(_LANE, min(cap, half)))


def mlp_forward(x, params, *, block_b=None):
    """x: [B, D_in] (any float dtype, streamed natively). PyTorch-style squeezed output."""
    w1, b1, w2, b2, w3, b3 = params
    H, D_in = w1.shape
    B = x.shape[0]
    assert x.shape[1] == D_in

    itemsize = jnp.dtype(x.dtype).itemsize
    vmem_cap = _vmem_capacity_bytes()

    if block_b is None:
        block_b = _default_block_b(B, D_in, H, itemsize, vmem_cap)
    block_b = int(min(block_b, B))
    if block_b < B:
        # Multi-block path: lane-dense output blocks (and x sublane blocks)
        # must be 128-aligned; the ragged last block is handled by Pallas.
        block_b = max(_LANE, (block_b // _LANE) * _LANE)
        if block_b >= B:
            block_b = B

    num_blocks = pl.cdiv(B, block_b)

    est_vmem = (_per_row_vmem_bytes(D_in, H, itemsize) * block_b
                + _fixed_vmem_bytes(D_in, H))
    vmem_limit = int(min(max(est_vmem, 32 << 20), vmem_cap - (4 << 20)))

    # TODO(synk): block-diagonal packing (8 batch rows per 128-lane row with
    # expanded W1/W2) would remove the D_in->128 lane padding of the x tile
    # entirely and raise the MXU contraction to K=128 — next structural step.
    out = pl.pallas_call(
        mlp_kernel,
        out_shape=jax.ShapeDtypeStruct((1, B), jnp.float32),
        grid=(num_blocks,),
        in_specs=[
            pl.BlockSpec((block_b, D_in), lambda i: (i, 0)),      # x (streamed, native dtype)
            pl.BlockSpec((H, D_in), lambda i: (0, 0)),            # w1 (PyTorch layout)
            pl.BlockSpec((H, 1), lambda i: (0, 0)),               # b1 column
            pl.BlockSpec((2, H), lambda i: (0, 0)),               # w2 (PyTorch layout)
            pl.BlockSpec(memory_space=pltpu.MemorySpace.SMEM),    # b2 (2,)  scalars
            pl.BlockSpec(memory_space=pltpu.MemorySpace.SMEM),    # w3 (2,)  scalars
            pl.BlockSpec(memory_space=pltpu.MemorySpace.SMEM),    # b3 (1,)  scalar
        ],
        out_specs=pl.BlockSpec((1, block_b), lambda i: (0, i)),   # lane-dense row
        compiler_params=pltpu.CompilerParams(
            dimension_semantics=("parallel",),
            vmem_limit_bytes=vmem_limit),
    )(x, w1, b1, w2, b2, w3, b3)

    return jnp.squeeze(out)      # PyTorch .squeeze(); out rows beyond B never written


def init_params(key, input_size, hidden_size):
    ks = jax.random.split(key, 6)

    def lin(kw, kb, fan_in, fan_out):
        bound = 1.0 / jnp.sqrt(fan_in)
        w = jax.random.uniform(kw, (fan_out, fan_in), jnp.float32, -bound, bound)
        b = jax.random.uniform(kb, (fan_out,), jnp.float32, -bound, bound)
        return w, b

    w1, b1 = lin(ks[0], ks[1], input_size, hidden_size)   # (H, D_in), (H,)
    w2, b2 = lin(ks[2], ks[3], hidden_size, 2)            # (2, H), (2,)
    w3, b3 = lin(ks[4], ks[5], 2, 1)                      # (1, 2), (1,)
    return (w1, b1.reshape(hidden_size, 1), w2, b2, w3.reshape(2), b3)


def mlp_reference(x, params):
    w1, b1, w2, b2, w3, b3 = params
    xf = x.astype(jnp.float32)
    h1 = jnp.maximum(xf @ w1.T + b1[:, 0], 0.0)
    h2 = jnp.maximum(h1 @ w2.T + b2, 0.0)
    y = jax.nn.sigmoid(h2 @ w3.reshape(2, 1) + b3)
    return jnp.squeeze(y)


if __name__ == "__main__":
    key = jax.random.PRNGKey(0)
    k_x, k_x2, k_x3, k_p = jax.random.split(key, 4)

    INPUT_SIZE, HIDDEN_SIZE = 16, 32
    params = init_params(k_p, INPUT_SIZE, HIDDEN_SIZE)

    # Small batch: single block, block dims fall back to the full array dims.
    x_small = jax.random.normal(k_x, (8, INPUT_SIZE), jnp.float32)
    y_small = jax.block_until_ready(mlp_forward(x_small, params))
    ref_small = mlp_reference(x_small, params)
    assert y_small.shape == (8,), y_small.shape
    assert jnp.allclose(y_small, ref_small, atol=2e-5, rtol=2e-5)

    # Non-divisible batch with explicit tile: exercises ragged last block
    # (no wrapper jnp.pad), 128-wide lane-dense output blocks, masked writeback.
    x_mid = jax.random.normal(k_x2, (300, INPUT_SIZE), jnp.float32)
    y_mid = jax.block_until_ready(mlp_forward(x_mid, params, block_b=128))
    ref_mid = mlp_reference(x_mid, params)
    assert y_mid.shape == (300,), y_mid.shape
    assert jnp.allclose(y_mid, ref_mid, atol=2e-5, rtol=2e-5)

    # bf16 input streamed in its native dtype (halves the dominant HBM read);
    # default block picker gives >= 2 grid steps for the "parallel" batch axis.
    x_bf = jax.random.normal(k_x3, (1500, INPUT_SIZE), jnp.float32).astype(jnp.bfloat16)
    y_bf = jax.block_until_ready(mlp_forward(x_bf, params))
    ref_bf = mlp_reference(x_bf, params)
    assert y_bf.shape == (1500,), y_bf.shape
    assert jnp.allclose(y_bf, ref_bf, atol=2e-5, rtol=2e-5)

    print("KERNEL_OK")
</pallas_src>

<mosaic_0001>
module attributes {stable_mosaic.version = 11 : i64} {
  func.func @mlp_kernel(%arg0: i32, %arg1: memref<8x16xf32, #tpu.memory_space<vmem>>, %arg2: memref<32x16xf32, #tpu.memory_space<vmem>>, %arg3: memref<32x1xf32, #tpu.memory_space<vmem>>, %arg4: memref<2x32xf32, #tpu.memory_space<vmem>>, %arg5: memref<2xf32, #tpu.memory_space<smem>>, %arg6: memref<2xf32, #tpu.memory_space<smem>>, %arg7: memref<1xf32, #tpu.memory_space<smem>>, %arg8: memref<1x8xf32, #tpu.memory_space<vmem>>) attributes {dimension_semantics = [#tpu.dimension_semantics<parallel>], iteration_bounds = array<i64: 1>, scalar_prefetch = 0 : i64, scratch_operands = 0 : i64, tpu.core_type = #tpu.core_type<tc>, window_params = [{transform_indices = @transform_0, window_bounds = array<i64: 8, 16>}, {pipeline_mode = #tpu.pipeline_mode<synchronous>, transform_indices = @transform_1, window_bounds = array<i64: 32, 16>}, {pipeline_mode = #tpu.pipeline_mode<synchronous>, transform_indices = @transform_2, window_bounds = array<i64: 32, 1>}, {pipeline_mode = #tpu.pipeline_mode<synchronous>, transform_indices = @transform_3, window_bounds = array<i64: 2, 32>}, {transform_indices = @transform_4, window_bounds = array<i64: 2>}, {transform_indices = @transform_5, window_bounds = array<i64: 2>}, {transform_indices = @transform_6, window_bounds = array<i64: 1>}, {transform_indices = @transform_7, window_bounds = array<i64: 1, 8>}]} {
    %c0 = arith.constant 0 : index
    %c0_0 = arith.constant 0 : index
    %0 = vector.load %arg1[%c0, %c0_0] : memref<8x16xf32, #tpu.memory_space<vmem>>, vector<8x16xf32>
    %c0_1 = arith.constant 0 : index
    %c0_2 = arith.constant 0 : index
    %1 = vector.load %arg2[%c0_1, %c0_2] : memref<32x16xf32, #tpu.memory_space<vmem>>, vector<32x16xf32>
    %cst = arith.constant dense<0.000000e+00> : vector<32x8xf32>
    %2 = tpu.matmul %1, %0, %cst {dimension_numbers = #tpu.dot_dimension_numbers<[1], [1], [0], [0], [0, 0, 1, 0], [], []>} : vector<32x16xf32>, vector<8x16xf32>, vector<32x8xf32> -> vector<32x8xf32>
    %c0_3 = arith.constant 0 : index
    %c0_4 = arith.constant 0 : index
    %3 = vector.load %arg3[%c0_3, %c0_4] : memref<32x1xf32, #tpu.memory_space<vmem>>, vector<32x1xf32>
    %4 = vector.broadcast %3 : vector<32x1xf32> to vector<32x8xf32>
    %5 = arith.addf %2, %4 : vector<32x8xf32>
    %cst_5 = arith.constant 0.000000e+00 : f32
    %6 = vector.broadcast %cst_5 : f32 to vector<32x8xf32>
    %7 = arith.maximumf %5, %6 : vector<32x8xf32>
    %c0_6 = arith.constant 0 : index
    %c0_7 = arith.constant 0 : index
    %8 = vector.load %arg4[%c0_6, %c0_7] : memref<2x32xf32, #tpu.memory_space<vmem>>, vector<2x32xf32>
    %cst_8 = arith.constant dense<0.000000e+00> : vector<2x8xf32>
    %9 = tpu.matmul %8, %7, %cst_8 {dimension_numbers = #tpu.dot_dimension_numbers<[1], [0], [0], [1], [0, 0, 1, 1], [], []>} : vector<2x32xf32>, vector<32x8xf32>, vector<2x8xf32> -> vector<2x8xf32>
    %10 = vector.extract_strided_slice %9 {offsets = [0, 0], sizes = [1, 8], strides = [1, 1]} : vector<2x8xf32> to vector<1x8xf32>
    %c0_9 = arith.constant 0 : index
    %11 = memref.load %arg5[%c0_9] : memref<2xf32, #tpu.memory_space<smem>>
    %12 = vector.broadcast %11 : f32 to vector<1x8xf32>
    %13 = arith.addf %10, %12 : vector<1x8xf32>
    %cst_10 = arith.constant 0.000000e+00 : f32
    %14 = vector.broadcast %cst_10 : f32 to vector<1x8xf32>
    %15 = arith.maximumf %13, %14 : vector<1x8xf32>
    %16 = vector.extract_strided_slice %9 {offsets = [1, 0], sizes = [1, 8], strides = [1, 1]} : vector<2x8xf32> to vector<1x8xf32>
    %c1 = arith.constant 1 : index
    %17 = memref.load %arg5[%c1] : memref<2xf32, #tpu.memory_space<smem>>
    %18 = vector.broadcast %17 : f32 to vector<1x8xf32>
    %19 = arith.addf %16, %18 : vector<1x8xf32>
    %cst_11 = arith.constant 0.000000e+00 : f32
    %20 = vector.broadcast %cst_11 : f32 to vector<1x8xf32>
    %21 = arith.maximumf %19, %20 : vector<1x8xf32>
    %c0_12 = arith.constant 0 : index
    %22 = memref.load %arg6[%c0_12] : memref<2xf32, #tpu.memory_space<smem>>
    %23 = vector.broadcast %22 : f32 to vector<1x8xf32>
    %24 = arith.mulf %15, %23 : vector<1x8xf32>
    %c1_13 = arith.constant 1 : index
    %25 = memref.load %arg6[%c1_13] : memref<2xf32, #tpu.memory_space<smem>>
    %26 = vector.broadcast %25 : f32 to vector<1x8xf32>
    %27 = arith.mulf %21, %26 : vector<1x8xf32>
    %28 = arith.addf %24, %27 : vector<1x8xf32>
    %c0_14 = arith.constant 0 : index
    %29 = memref.load %arg7[%c0_14] : memref<1xf32, #tpu.memory_space<smem>>
    %30 = vector.broadcast %29 : f32 to vector<1x8xf32>
    %31 = arith.addf %28, %30 : vector<1x8xf32>
    %32 = arith.negf %31 : vector<1x8xf32>
    %33 = math.exp %32 : vector<1x8xf32>
    %cst_15 = arith.constant 1.000000e+00 : f32
    %34 = vector.broadcast %cst_15 : f32 to vector<1x8xf32>
    %35 = arith.addf %34, %33 : vector<1x8xf32>
    %36 = arith.divf %34, %35 : vector<1x8xf32>
    %c0_16 = arith.constant 0 : index
    %c0_17 = arith.constant 0 : index
    %37 = vector.load %arg8[%c0_16, %c0_17] : memref<1x8xf32, #tpu.memory_space<vmem>>, vector<1x8xf32>
    tpu.vector_store %arg8[%c0_16, %c0_17], %36 {strides = array<i32>} : memref<1x8xf32, #tpu.memory_space<vmem>>, vector<1x8xf32>,
    return
  }
  func.func @transform_0(%arg0: i32) -> (i32, i32) {
    %c0_i32 = arith.constant 0 : i32
    %c0_i32_0 = arith.constant 0 : i32
    return %arg0, %c0_i32 : i32, i32
  }
  func.func @transform_1(%arg0: i32) -> (i32, i32) {
    %c0_i32 = arith.constant 0 : i32
    %c0_i32_0 = arith.constant 0 : i32
    %c0_i32_1 = arith.constant 0 : i32
    return %c0_i32, %c0_i32_0 : i32, i32
  }
  func.func @transform_2(%arg0: i32) -> (i32, i32) {
    %c0_i32 = arith.constant 0 : i32
    %c0_i32_0 = arith.constant 0 : i32
    %c0_i32_1 = arith.constant 0 : i32
    return %c0_i32, %c0_i32_0 : i32, i32
  }
  func.func @transform_3(%arg0: i32) -> (i32, i32) {
    %c0_i32 = arith.constant 0 : i32
    %c0_i32_0 = arith.constant 0 : i32
    %c0_i32_1 = arith.constant 0 : i32
    return %c0_i32, %c0_i32_0 : i32, i32
  }
  func.func @transform_4(%arg0: i32) -> i32 {
    %c0_i32 = arith.constant 0 : i32
    %c0_i32_0 = arith.constant 0 : i32
    return %c0_i32 : i32
  }
  func.func @transform_5(%arg0: i32) -> i32 {
    %c0_i32 = arith.constant 0 : i32
    %c0_i32_0 = arith.constant 0 : i32
    return %c0_i32 : i32
  }
  func.func @transform_6(%arg0: i32) -> i32 {
    %c0_i32 = arith.constant 0 : i32
    %c0_i32_0 = arith.constant 0 : i32
    return %c0_i32 : i32
  }
  func.func @transform_7(%arg0: i32) -> (i32, i32) {
    %c0_i32 = arith.constant 0 : i32
    %c0_i32_0 = arith.constant 0 : i32
    return %c0_i32, %arg0 : i32, i32
  }
}

</mosaic_0001>

<bundles_post_ra>
// kernel: tpu_custom_call.1
= control target key start
LH: loop header
LB: loop body
LE: loop exit
PB: predicated region body
PF: predicated region fallthrough
CT: control target
= control target key end

     0   :  { %13 = vsyncpa [#allocation5], 0  ;;  %s501_s0 = inlined_call_operand.vmem [shape: f32[8,16], index: 0, kind: input, shape index: {}]   ;;  %s502_s1 = inlined_call_operand.vmem [shape: f32[32,16], index: 1, kind: input, shape index: {}]   ;;  %s503_s2 = inlined_call_operand.vmem [shape: f32[32,1], index: 2, kind: input, shape index: {}]   ;;  %s504_s3 = inlined_call_operand.vmem [shape: f32[2,32], index: 3, kind: input, shape index: {}]   ;;  %s505_s4 = inlined_call_operand.vmem [shape: f32[2], index: 4, kind: input, shape index: {}]   ;;  %s506_s5 = inlined_call_operand.vmem [shape: f32[2], index: 5, kind: input, shape index: {}]   ;;  %s507_s6 = inlined_call_operand.<no memory space> [shape: f32[1], index: 6, kind: input, shape index: {}]   ;;  %s508_s7 = inlined_call_operand.hbm [shape: f32[1,8], index: 7, kind: output, shape index: {}]  }
   0x1   :  { %14 = vsyncpa [#allocation7], 0 }
   0x2   :  { %15 = vsyncpa [#allocation4], 0  ;;  %s30_s26 = sshll.u32 %s505_s4, 4  ;;  %s40_s29 = sshll.u32 %s506_s5, 4  ;;  %s31_s26 = int_to_ptr.vmem [resolvable:$true] %s30_s26  ;;  %s41_s29 = int_to_ptr.vmem [resolvable:$true] %s40_s29 }
   0x3   :  { %s357_s30 = scalar_lea.vmem %s31_s26, 16  ;;  %p362_p1 = scmp.lt.s32.totalorder %s31_s26, %s31_s26 }
   0x4   :  { %p358_p0 = scmp.ne.s32.totalorder %s31_s26, %s357_s30  ;;  %p363_p2 = scmp.lt.s32.totalorder %s357_s30, %s357_s30 }
   0x6   :  { %p364_p3 = por %p363_p2, %p362_p1 }
   0x8   :  { %p365_p4 = pnand %p364_p3, %p358_p0 }
   0xa   :  { %368 = shalt.err (!%p365_p4)
}
   0xb   :  { %s407_s8 = smov [#allocation3]   ;;  %s369_s9 = scalar_lea.vmem %s41_s29, 16 }
   0xc   :  { %33 = dma.vmem_to_smem %s31_s26, 16, %s407_s8, [#allocation5]  }
   0xd   :  { %p370_p5 = scmp.ne.s32.totalorder %s41_s29, %s369_s9  ;;  %p374_p6 = scmp.lt.s32.totalorder %s41_s29, %s41_s29 }
   0xe   :  { %p375_p7 = scmp.lt.s32.totalorder %s369_s9, %s369_s9 }
  0x10   :  { %p376_p8 = por %p375_p7, %p374_p6 }
  0x12   :  { %p377_p9 = pnand %p376_p8, %p370_p5 }
  0x14   :  { %380 = shalt.err (!%p377_p9)
}
  0x15   :  { %s408_s4 = smov [#allocation6]  }
  0x16   :  { %43 = dma.vmem_to_smem %s41_s29, 16, %s408_s4, [#allocation7]  }
  0x17   :  { %401 = dma.done.wait [#allocation5], 16  }
  0x18   :  { %402 = vsyncadd [#allocation5], 4294967280 }
  0x19   :  { %403 = dma.done.wait [#allocation7], 16  }
  0x1a   :  { %404 = vsyncadd [#allocation7], 4294967280 }
  0x1b   :  { %52 = sfence }
  0x1c   :  { %v53_v0 = vld [vmem:[%s501_s0] sm:$0xff]  ;;  %vm82_vm0 = vcmask 130048   ;;  %v61_v2 = vld [vmem:[%s503_s2 + $0x18] sm:$0xff]  ;;  %v55_v3 = vld [vmem:[%s502_s1 + $0x8] sm:$0xff]  ;;  %v409_v4 = vmov 0   ;;  %v410_v10 = vmov 0.0   ;;  %v281_v41 = vstv %s507_s6 }
  0x1d   :  { %v54_v1 = vld [vmem:[%s502_s1] sm:$0xff]  ;;  %326 = vmatprep.subr.msk.mxu0 %vm82_vm0, %v53_v0  ;;  %352 = vset.pattern.permute.xlu1 %v409_v4  ;;  %v59_v5 = vld [vmem:[%s503_s2 + $0x8] sm:$0xff]  ;;  %v56_v6 = vld [vmem:[%s502_s1 + $0x10] sm:$0xff]  ;;  %vm411_vm1 = vmmov 0   ;;  %vm188_vm2 = vcmask 261120   ;;  %s262_s26 = sld [smem:[#allocation3]] }
  0x1e   :  { %328 = vmatprep.mubr.msk.f32.mxu0 %vm82_vm0, %v54_v1  ;;  %327 = vmatpush3.xpose.msk.msra.mxu0 %vm82_vm0, %v53_v0  ;;  %v58_v7 = vld [vmem:[%s503_s2] sm:$0xff]  ;;  %v60_v8 = vld [vmem:[%s503_s2 + $0x10] sm:$0xff]  ;;  %v57_v9 = vld [vmem:[%s502_s1 + $0x18] sm:$0xff]  ;;  %s313_s27 = sld [smem:[#allocation3 + $0x1]]  ;;  %s412_s8 = smov [#allocation8]   ;;  %vm289_vm3 = vcmask 57344  }
  0x1f   :  { %351 = vset.pattern.permute.xlu0 %v409_v4  ;;  %69 = vperm.xlu1 %352, %v59_v5   ;;  %v187_v27 = vld [vmem:[%s504_s3] sm:$0x3]  ;;  %s314_s28 = sld [smem:[#allocation6 + $0x1]]  ;;  %s297_s9 = sshll.u32 %s412_s8, 4  ;;  %s298_s9 = int_to_ptr.vmem [resolvable:$true] %s297_s9 }
  0x20   :  { %79 = vperm.xlu0 %351, %v61_v2   ;;  %334 = vmatprep.subr.mxu1 %v410_v10  ;;  %s270_s29 = sld [smem:[#allocation6]]  ;;  %s381_s4 = scalar_lea.vmem %s298_s9, 16 }
  0x21   :  { %329 = vmatmul.mubr.msk.f32.vlgmr.msra.gmra.mxu0 %vm82_vm0, %v55_v3  ;;  %342 = vmatprep.mubr.msk.f32.mxu1 %vm411_vm1, %v410_v10  ;;  %p382_p10 = scmp.ne.s32.totalorder %s298_s9, %s381_s4  ;;  %s385_s5 = scalar_lea.vmem %s298_s9, 32 }
  0x22   :  { %331 = vmatprep.mubr.msk.f32.mxu0 %vm82_vm0, %v56_v6  ;;  %p386_p11 = scmp.lt.s32.totalorder %s298_s9, %s298_s9  ;;  %p387_p12 = scmp.lt.s32.totalorder %s385_s5, %s381_s4 }
  0x23   :  { %64 = vperm.xlu1 %352, %v58_v7   ;;  %v263_v28 = vstv %s262_s26 }
  0x24   :  { %74 = vperm.xlu0 %351, %v60_v8   ;;  %v267_v29 = vstv %s313_s27  ;;  %p388_p13 = por %p387_p12, %p386_p11 }
  0x25   :  { %332 = vmatmul.mubr.msk.f32.gmra.mxu0 %vm82_vm0, %v57_v9  ;;  %v274_v33 = vstv %s314_s28 }
  0x26   :  { %v271_v37 = vstv %s270_s29  ;;  %p389_p0 = pnand %p388_p13, %p382_p10 }
  0x9a   :  { %v70_v11 = vpop.permute.xlu1 %69 }
  0x9b   :  { %v80_v12 = vpop.permute.xlu0 %79 }
  0x9e   :  { %v65_v16 = vpop.permute.xlu1 %64 }
  0x9f   :  { %v75_v18 = vpop.permute.xlu0 %74 }
  0xe1   :  { %v330_v13 = vpop.f32.mrf.mxu0 }
  0xe2   :  { %v170_v20 = vadd.f32 %v330_v13, %v70_v11 }
  0xe3   :  { %v164_v14 = vpop.f32.mrf.mxu0 }
  0xe4   :  { %v165_v23 = vadd.f32 %v164_v14, %v65_v16  ;;  %v184_v25 = vmax.f32 %v170_v20, 0.0 }
  0xe5   :  { %v333_v15 = vpop.f32.mrf.mxu0 }
  0xe6   :  { %v180_v17 = vadd.f32 %v333_v15, %v80_v12  ;;  %v183_v26 = vmax.f32 %v165_v23, 0.0 }
  0xe7   :  { %v174_v19 = vpop.f32.mrf.mxu0 }
  0xe8   :  { %v186_v21 = vmax.f32 %v180_v17, 0.0  ;;  %v175_v22 = vadd.f32 %v174_v19, %v75_v18 }
  0xea   :  { %v185_v24 = vmax.f32 %v175_v22, 0.0  ;;  %335 = vmatpush3.msra.mxu1 %v186_v21 }
  0xeb   :  { %336 = vmatprep.subr.mxu1 %v410_v10 }
  0xec   :  { %337 = vmatpush3.msra.mxu1 %v185_v24 }
  0xed   :  { %338 = vmatprep.subr.mxu1 %v410_v10 }
  0xee   :  { %339 = vmatpush3.msra.mxu1 %v184_v25 }
  0xef   :  { %340 = vmatprep.subr.mxu1 %v410_v10 }
  0xf0   :  { %341 = vmatpush3.msra.mxu1 %v183_v26 }
  0xf1   :  { %343 = vmatmul.mubr.msk.f32.vlgmr.msra.gmra.mxu1 %vm188_vm2, %v187_v27 }
 0x1b1   :  { %v258_v30 = vpop.f32.mrf.mxu1 }
 0x1b2   :  { %v264_v31 = vadd.f32 %v263_v28, %v258_v30  ;;  %v268_v32 = vadd.f32 %v267_v29, %v258_v30 }
 0x1b3   :  { %v344_v34 = vpop.f32.mrf.mxu1 }
 0x1b4   :  { %v265_v35 = vmax.f32 %v264_v31, 0.0  ;;  %v269_v36 = vmax.f32 %v268_v32, 0.0 }
 0x1b6   :  { %v275_v38 = vmul.f32 %v274_v33, %v269_v36  ;;  %v272_v39 = vmul.f32 %v271_v37, %v265_v35 }
 0x1b8   :  { %v277_v40 = vrot.slane %v275_v38, 1 }
 0x1ba   :  { %v279_v42 = vadd.f32 %v277_v40, %v272_v39 }
 0x1bc   :  { %v282_v43 = vadd.f32 %v281_v41, %v279_v42 }
 0x1be   :  { %v315_v44 = vmul.f32 -1.442695, %v282_v43 }
 0x1c0   :  { %353 = vpow2.f32 %v315_v44 }
 0x1cd   :  { %v354_v45 = vpop.eup %353 }
 0x1ce   :  { %v286_v46 = vadd.f32 1.0, %v354_v45 }
 0x1d0   :  { %355 = vrcp.f32 %v286_v46 }
 0x1dd   :  { %v356_v47 = vpop.eup %355 }
 0x1de   :  { %290 = vst.msk [vmem:[#allocation8] sm:$0x1] %vm289_vm3, %v356_v47 }
 0x1df   :  { %392 = shalt.err (!%p389_p0)
}
 0x1e0   :  { %300 = dma.vmem_to_hbm [thread:$0]  %s298_s9, 16, %s508_s7, [#allocation4]  }
 0x1e1   :  { %405 = dma.done.wait [#allocation4], 16  }
 0x1e2   :  { %406 = vsyncadd [#allocation4], 4294967280 }
 0x1e3   :  { %304 = vsyncpa [#allocation4], 1 }
 0x1e4   :  { %305 = vsyncpa [#allocation5], 1 }
 0x1e5   :  { %306 = vsyncpa [#allocation7], 1 }

</bundles_post_ra>
